<compile_context>
chip_gen: v5e
topology: v5e:2x2
jax: 0.10.0
libtpu: 0.0.40
codegen_flags: <defaults>
</compile_context>

<pallas_src>
import math
import functools

import jax
import jax.numpy as jnp
import numpy as np
from jax import lax
from jax.experimental import pallas as pl
from jax.experimental.pallas import tpu as pltpu


def _round_up(x, m):
    return ((x + m - 1) // m) * m


def _block_diag(rel):
    """(R, H, d_k, d_k) -> (R, H*d_k, H*d_k) block-diagonal matrices."""
    num_rel, n_heads, d_k, _ = rel.shape
    eye = jnp.eye(n_heads, dtype=rel.dtype)
    bd = jnp.einsum("rhij,hg->rhigj", rel, eye)
    return bd.reshape(num_rel, n_heads * d_k, n_heads * d_k)


def _pick_vmem_limit():
    """Generation-aware VMEM limit: ~85% of physical, capped at 110 MiB."""
    cap = None
    try:
        cap = getattr(pltpu.get_tpu_info(), "vmem_capacity_bytes", None)
    except Exception:
        cap = None
    if not cap:
        cap = 64 * 1024 * 1024          # conservative v7x fallback
    return int(min(int(cap) * 0.85, 110 * 1024 * 1024))


# -----------------------------------------------------------------------------
# Projection kernel #1: per-etype K|V with rel_att/rel_msg (+pri/sqrt_dk)
# already folded into the effective weights. One lane-dense (in, 2*out) matmul.
# -----------------------------------------------------------------------------
def kv_proj_kernel(src_tid_ref, h_ref, w_ref, b_ref, kv_ref):
    x = h_ref[0]                                             # (tp, in)  bf16
    kv = jnp.dot(x, w_ref[0], preferred_element_type=jnp.float32) + b_ref[0]
    kv_ref[0] = kv.astype(kv_ref.dtype)                      # store bf16


# -----------------------------------------------------------------------------
# Projection kernel #2: per-dst-node-type Q (computed once, reused by every
# etype / dst tile that targets this node type).
# -----------------------------------------------------------------------------
def q_proj_kernel(h_ref, w_ref, b_ref, q_ref):
    q = jnp.dot(h_ref[0], w_ref[0], preferred_element_type=jnp.float32) + b_ref[0]
    q_ref[0] = q.astype(q_ref.dtype)


# -----------------------------------------------------------------------------
# Attention kernel: grid = (dst tiles, etypes, src/KV tiles).
#   * flash-style online softmax over the src axis (per-head m/l/acc scratch)
#   * cross-etype accumulation in a VMEM scratch (etypes sharing a dst type are
#     contiguous on the grid); mean + residual and the single output store
#     happen only at the last (etype, src tile) of each dst group.
# -----------------------------------------------------------------------------
def qt_attn_kernel(dst_tid_ref, first_ref, last_ref, n_src_ref, inv_cnt_ref,
                   q_ref, kv_ref, hdst_ref, out_ref,
                   m_ref, l_ref, acc_ref, gacc_ref,
                   *, n_heads, d_k):
    out_dim = n_heads * d_k
    e = pl.program_id(1)
    s = pl.program_id(2)
    is_first_et = first_ref[e] == 1
    is_last_et = last_ref[e] == 1
    is_first_src = s == 0
    is_last_src = s == pl.num_programs(2) - 1

    @pl.when(jnp.logical_and(is_first_et, is_first_src))
    def _():
        gacc_ref[...] = jnp.zeros_like(gacc_ref)

    @pl.when(is_first_src)
    def _():
        m_ref[...] = jnp.full_like(m_ref, -jnp.inf)
        l_ref[...] = jnp.zeros_like(l_ref)
        acc_ref[...] = jnp.zeros_like(acc_ref)

    q = q_ref[0]                        # (td, out_dim)    bf16
    kv = kv_ref[0]                      # (ts, 2*out_dim)  bf16
    td = q.shape[0]
    ts = kv.shape[0]

    # Mask padded source rows of this KV tile.  Padding is trailing, so the
    # first tile always holds >=1 valid row and the online softmax never
    # degenerates (all-masked later tiles contribute exactly zero).
    row0 = s * ts
    valid = (row0 + lax.broadcasted_iota(jnp.int32, (td, ts), 1)) < n_src_ref[e]

    for hi in range(n_heads):           # static, unrolled
        sl_k = slice(hi * d_k, (hi + 1) * d_k)
        sl_v = slice(out_dim + hi * d_k, out_dim + (hi + 1) * d_k)
        # NT dot_general (contract last dims): no materialized transpose.
        sc = lax.dot_general(q[:, sl_k], kv[:, sl_k], (((1,), (1,)), ((), ())),
                             preferred_element_type=jnp.float32)    # (td, ts)
        sc = jnp.where(valid, sc, jnp.float32(-1e30))
        m_prev = m_ref[hi]                                           # (td, 1)
        m_new = jnp.maximum(m_prev, jnp.max(sc, axis=-1, keepdims=True))
        alpha = jnp.exp(m_prev - m_new)
        p = jnp.exp(sc - m_new)
        l_ref[hi] = alpha * l_ref[hi] + jnp.sum(p, axis=-1, keepdims=True)
        acc_ref[hi] = alpha * acc_ref[hi] + jnp.dot(
            p.astype(kv.dtype), kv[:, sl_v], preferred_element_type=jnp.float32)
        m_ref[hi] = m_new

    @pl.when(is_last_src)
    def _():
        # Normalize this etype's contribution (exact divide — see review) and
        # fold it into the dst-group accumulator at static column offsets
        # (no jnp.concatenate of lane-sparse per-head tiles).
        for hi in range(n_heads):
            sl = slice(hi * d_k, (hi + 1) * d_k)
            gacc_ref[:, sl] = gacc_ref[:, sl] + acc_ref[hi] / l_ref[hi]

    @pl.when(jnp.logical_and(is_last_et, is_last_src))
    def _():
        # cross_reducer='mean' over etypes, then residual (use_norm=False).
        # Single store of the output block per dst group.
        out_ref[0] = gacc_ref[...] * inv_cnt_ref[e] + hdst_ref[0]


# -----------------------------------------------------------------------------
# Wrapper
# -----------------------------------------------------------------------------
def qt_layer_forward(h, params, canonical_etypes, node_dict, edge_dict,
                     *, n_heads, d_k):
    out_dim = n_heads * d_k
    in_dim = next(iter(h.values())).shape[1]
    assert in_dim == out_dim, "residual add (t + h) requires in_dim == out_dim"
    sqrt_dk = math.sqrt(d_k)

    if len(canonical_etypes) == 0:
        return {nt: h[nt] for nt in h}

    types_by_id = sorted(node_dict, key=node_dict.get)
    num_types = len(types_by_id)
    max_n = max(h[nt].shape[0] for nt in types_by_id)

    # ---- tile sizes ---------------------------------------------------------
    # dst row tile (parallel grid axis).  If one tile would cover all rows,
    # halve it so the 'parallel' axis has >=2 blocks (v7x has 2 TensorCores).
    td = min(128, _round_up(max_n, 8))
    if _round_up(max_n, td) // td < 2 and td > 8:
        td = _round_up(td // 2, 8)
    n_pad = _round_up(max_n, td)
    num_dst_tiles = n_pad // td
    ts = td                    # src/KV tile (flash-style inner grid axis)
    # TODO(synk): raise ts toward 512 rows on large graphs (must divide n_pad).
    num_src_tiles = n_pad // ts
    tp = td                    # projection row tile

    vmem_limit = _pick_vmem_limit()

    # ---- stacked, zero-padded node features ---------------------------------
    H32 = jnp.stack([jnp.pad(h[nt].astype(jnp.float32),
                             ((0, n_pad - h[nt].shape[0]), (0, 0)))
                     for nt in types_by_id])       # (T, n_pad, in) f32 (residual)
    H16 = H32.astype(jnp.bfloat16)                 # bf16 MXU / DMA operand

    # ---- per-etype tables (sorted so etypes sharing a dst type are contiguous)
    ets = sorted(canonical_etypes, key=lambda ce: node_dict[ce[2]])
    E = len(ets)
    dst_ids = [node_dict[d] for (_, _, d) in ets]
    # In-kernel group accumulation relies on this contiguity invariant.
    assert all(dst_ids[i] <= dst_ids[i + 1] for i in range(E - 1))
    for (srct, _, _) in ets:
        assert h[srct].shape[0] > 0, "source node type with zero nodes unsupported"

    cnt_per_dst = {}
    for did in dst_ids:
        cnt_per_dst[did] = cnt_per_dst.get(did, 0) + 1

    src_tid = np.zeros((E,), np.int32)
    dst_tid = np.zeros((E,), np.int32)
    rel_id = np.zeros((E,), np.int32)
    first = np.zeros((E,), np.int32)
    last = np.zeros((E,), np.int32)
    n_src = np.zeros((E,), np.int32)
    inv_cnt = np.zeros((E,), np.float32)
    for i, (s, et, d) in enumerate(ets):
        sid, did, eid = node_dict[s], node_dict[d], edge_dict[et]
        src_tid[i], dst_tid[i], rel_id[i] = sid, did, eid
        first[i] = 1 if (i == 0 or dst_ids[i - 1] != did) else 0
        last[i] = 1 if (i == E - 1 or dst_ids[i + 1] != did) else 0
        n_src[i] = h[s].shape[0]
        inv_cnt[i] = 1.0 / cnt_per_dst[did]

    # ---- fold relation transforms (+pri/sqrt_dk) into per-etype weights -----
    src_idx = jnp.asarray(src_tid)
    rel_idx = jnp.asarray(rel_id)
    ratt_scaled = params["rel_att"] * (params["rel_pri"] / sqrt_dk)[:, :, None, None]
    ratt_bd = _block_diag(ratt_scaled)                       # (R, out, out)
    rmsg_bd = _block_diag(params["rel_msg"])                 # (R, out, out)
    wk_eff = jnp.einsum("eio,eop->eip", params["wk"][src_idx], ratt_bd[rel_idx])
    bk_eff = jnp.einsum("eio,eop->eip", params["bk"][src_idx], ratt_bd[rel_idx])
    wv_eff = jnp.einsum("eio,eop->eip", params["wv"][src_idx], rmsg_bd[rel_idx])
    bv_eff = jnp.einsum("eio,eop->eip", params["bv"][src_idx], rmsg_bd[rel_idx])
    wkv = jnp.concatenate([wk_eff, wv_eff], axis=-1).astype(jnp.bfloat16)  # (E,in,2*out)
    bkv = jnp.concatenate([bk_eff, bv_eff], axis=-1).astype(jnp.float32)   # (E,1,2*out)

    # ---- projection call #1: per-etype K|V ----------------------------------
    kv = pl.pallas_call(
        kv_proj_kernel,
        grid_spec=pltpu.PrefetchScalarGridSpec(
            num_scalar_prefetch=1,
            grid=(E, n_pad // tp),
            in_specs=[
                pl.BlockSpec((1, tp, in_dim), lambda e, r, st: (st[e], r, 0)),
                pl.BlockSpec((1, in_dim, 2 * out_dim), lambda e, r, st: (e, 0, 0)),
                pl.BlockSpec((1, 1, 2 * out_dim), lambda e, r, st: (e, 0, 0)),
            ],
            out_specs=pl.BlockSpec((1, tp, 2 * out_dim), lambda e, r, st: (e, r, 0)),
        ),
        out_shape=jax.ShapeDtypeStruct((E, n_pad, 2 * out_dim), jnp.bfloat16),
        compiler_params=pltpu.CompilerParams(
            dimension_semantics=("parallel", "parallel"),
            vmem_limit_bytes=vmem_limit),
    )(jnp.asarray(src_tid), H16, wkv, bkv)

    # ---- projection call #2: per-dst-type Q ----------------------------------
    q_all = pl.pallas_call(
        q_proj_kernel,
        grid_spec=pltpu.PrefetchScalarGridSpec(
            num_scalar_prefetch=0,
            grid=(num_types, n_pad // tp),
            in_specs=[
                pl.BlockSpec((1, tp, in_dim), lambda t, r: (t, r, 0)),
                pl.BlockSpec((1, in_dim, out_dim), lambda t, r: (t, 0, 0)),
                pl.BlockSpec((1, 1, out_dim), lambda t, r: (t, 0, 0)),
            ],
            out_specs=pl.BlockSpec((1, tp, out_dim), lambda t, r: (t, r, 0)),
        ),
        out_shape=jax.ShapeDtypeStruct((num_types, n_pad, out_dim), jnp.bfloat16),
        compiler_params=pltpu.CompilerParams(
            dimension_semantics=("parallel", "parallel"),
            vmem_limit_bytes=vmem_limit),
    )(H16, params["wq"].astype(jnp.bfloat16), params["bq"].astype(jnp.float32))

    # ---- attention call: grid = (dst tiles, etypes, src tiles) --------------
    prefetch = [jnp.asarray(dst_tid), jnp.asarray(first), jnp.asarray(last),
                jnp.asarray(n_src), jnp.asarray(inv_cnt)]

    def dst_map(d, e, s, dt, fi, la, ns, ic):
        return (dt[e], d, 0)

    def kv_map(d, e, s, dt, fi, la, ns, ic):
        return (e, s, 0)

    kernel = functools.partial(qt_attn_kernel, n_heads=n_heads, d_k=d_k)

    n_steps = num_dst_tiles * E * num_src_tiles
    cost = pl.CostEstimate(
        flops=4 * n_steps * n_heads * td * ts * d_k,
        transcendentals=n_steps * n_heads * td * (ts + 1),
        bytes_accessed=(kv.size * 2 * num_dst_tiles
                        + n_steps * td * (out_dim * 2 + in_dim * 4)
                        + num_types * n_pad * out_dim * 4),
    )

    out = pl.pallas_call(
        kernel,
        grid_spec=pltpu.PrefetchScalarGridSpec(
            num_scalar_prefetch=5,
            grid=(num_dst_tiles, E, num_src_tiles),
            in_specs=[
                pl.BlockSpec((1, td, out_dim), dst_map),       # Q      (bf16)
                pl.BlockSpec((1, ts, 2 * out_dim), kv_map),    # K|V    (bf16)
                pl.BlockSpec((1, td, in_dim), dst_map),        # h_dst  (f32, residual)
            ],
            out_specs=pl.BlockSpec((1, td, out_dim), dst_map),
            scratch_shapes=[
                pltpu.VMEM((n_heads, td, 1), jnp.float32),     # running max
                pltpu.VMEM((n_heads, td, 1), jnp.float32),     # running denom
                pltpu.VMEM((n_heads, td, d_k), jnp.float32),   # per-head acc
                pltpu.VMEM((td, out_dim), jnp.float32),        # per-dst-group acc
            ],
        ),
        out_shape=jax.ShapeDtypeStruct((num_types, n_pad, out_dim), jnp.float32),
        compiler_params=pltpu.CompilerParams(
            dimension_semantics=("parallel", "arbitrary", "arbitrary"),
            vmem_limit_bytes=vmem_limit),
        cost_estimate=cost,
    )(*prefetch, q_all, kv, H32)

    dst_types = set(dst_ids)
    new_h = {}
    for nt in h:
        tid = node_dict[nt]
        if tid in dst_types:
            new_h[nt] = out[tid, :h[nt].shape[0], :]
        else:
            # No incoming edge type: t == 0, so new_h = h (mean of nothing + h).
            new_h[nt] = h[nt]
    return new_h


# -----------------------------------------------------------------------------
# Pure-JAX reference (same dense-graph semantics) for verification.
# -----------------------------------------------------------------------------
def qt_layer_reference(h, params, canonical_etypes, node_dict, edge_dict,
                       *, n_heads, d_k):
    out_dim = n_heads * d_k
    sqrt_dk = math.sqrt(d_k)
    acc = {nt: jnp.zeros((h[nt].shape[0], out_dim), jnp.float32) for nt in h}
    cnt = {nt: 0 for nt in h}
    for (srctype, etype, dsttype) in canonical_etypes:
        s_id, d_id, e_id = node_dict[srctype], node_dict[dsttype], edge_dict[etype]
        k = (h[srctype] @ params["wk"][s_id] + params["bk"][s_id]).reshape(-1, n_heads, d_k)
        v = (h[srctype] @ params["wv"][s_id] + params["bv"][s_id]).reshape(-1, n_heads, d_k)
        q = (h[dsttype] @ params["wq"][d_id] + params["bq"][d_id]).reshape(-1, n_heads, d_k)
        k = jnp.einsum("bij,ijk->bik", k, params["rel_att"][e_id])
        v = jnp.einsum("bij,ijk->bik", v, params["rel_msg"][e_id])
        s = jnp.einsum("dhc,shc->hds", q, k) * (params["rel_pri"][e_id][:, None, None] / sqrt_dk)
        a = jax.nn.softmax(s, axis=-1)
        t = jnp.einsum("hds,shc->dhc", a, v).reshape(-1, out_dim)
        acc[dsttype] = acc[dsttype] + t
        cnt[dsttype] += 1
    return {nt: acc[nt] / float(max(cnt[nt], 1)) + h[nt] for nt in h}


# -----------------------------------------------------------------------------
# Main
# -----------------------------------------------------------------------------
if __name__ == "__main__":
    in_dim = 32
    out_dim = 32          # residual add requires in_dim == out_dim
    n_heads = 4
    d_k = out_dim // n_heads

    node_dict = {"A": 0, "B": 1}
    edge_dict = {"r0": 0, "r1": 1, "r2": 2}
    # canonical etypes (src, etype, dst): dense fully-connected sub-graphs
    canonical_etypes = [("A", "r0", "A"), ("B", "r1", "A"), ("A", "r2", "B")]

    num_types = len(node_dict)
    num_rel = len(edge_dict)
    n_nodes = {"A": 16, "B": 8}

    key = jax.random.PRNGKey(0)
    keys = jax.random.split(key, 16)

    def glorot(k, shape, fan_in, fan_out):
        bound = math.sqrt(6.0 / (fan_in + fan_out))
        return jax.random.uniform(k, shape, jnp.float32, -bound, bound)

    # Per-node-type linear params (weights pre-transposed to (in_dim, out_dim)).
    params = {
        "wk": glorot(keys[0], (num_types, in_dim, out_dim), in_dim, out_dim),
        "bk": jax.random.normal(keys[1], (num_types, 1, out_dim), jnp.float32) * 0.01,
        "wq": glorot(keys[2], (num_types, in_dim, out_dim), in_dim, out_dim),
        "bq": jax.random.normal(keys[3], (num_types, 1, out_dim), jnp.float32) * 0.01,
        "wv": glorot(keys[4], (num_types, in_dim, out_dim), in_dim, out_dim),
        "bv": jax.random.normal(keys[5], (num_types, 1, out_dim), jnp.float32) * 0.01,
        # relation tensors (xavier_uniform-style), relation_pri init = ones
        "rel_att": glorot(keys[6], (num_rel, n_heads, d_k, d_k), d_k, d_k),
        "rel_msg": glorot(keys[7], (num_rel, n_heads, d_k, d_k), d_k, d_k),
        "rel_pri": jnp.ones((num_rel, n_heads), jnp.float32),
    }
    # TODO(synk): a_linears / skip-gate / dropout / LayerNorm exist in __init__ but
    # are never used by the torch forward (trans_out = t + h, use_norm=False).

    # Node features h[ntype]: (num_nodes, in_dim)
    h = {
        "A": jax.random.normal(keys[8], (n_nodes["A"], in_dim), jnp.float32),
        "B": jax.random.normal(keys[9], (n_nodes["B"], in_dim), jnp.float32),
    }

    out = qt_layer_forward(h, params, canonical_etypes, node_dict, edge_dict,
                           n_heads=n_heads, d_k=d_k)
    out = jax.tree_util.tree_map(jax.block_until_ready, out)

    ref = qt_layer_reference(h, params, canonical_etypes, node_dict, edge_dict,
                             n_heads=n_heads, d_k=d_k)
    # Tolerance reflects bf16 MXU operands (Q/K/V, weights, p) with f32
    # accumulation; the f32 variant of this kernel verified at 1e-2 previously
    # and the softmax normalization now uses an exact divide.
    for nt in h:
        np.testing.assert_allclose(np.asarray(out[nt]), np.asarray(ref[nt]),
                                   rtol=3e-2, atol=3e-2)

    print("KERNEL_OK")
</pallas_src>

<mosaic_0001>
module attributes {stable_mosaic.version = 11 : i64} {
  func.func @kv_proj_kernel(%arg0: i32, %arg1: i32, %arg2: memref<3xi32, #tpu.memory_space<smem>>, %arg3: memref<1x8x32xbf16, #tpu.memory_space<vmem>>, %arg4: memref<1x32x64xbf16, #tpu.memory_space<vmem>>, %arg5: memref<1x1x64xf32, #tpu.memory_space<vmem>>, %arg6: memref<1x8x64xbf16, #tpu.memory_space<vmem>>) attributes {dimension_semantics = [#tpu.dimension_semantics<parallel>, #tpu.dimension_semantics<parallel>], iteration_bounds = array<i64: 3, 2>, scalar_prefetch = 1 : i64, scratch_operands = 0 : i64, tpu.core_type = #tpu.core_type<tc>, window_params = [{transform_indices = @transform_0, window_bounds = array<i64: 1, 8, 32>}, {transform_indices = @transform_1, window_bounds = array<i64: 1, 32, 64>}, {transform_indices = @transform_2, window_bounds = array<i64: 1, 1, 64>}, {transform_indices = @transform_3, window_bounds = array<i64: 1, 8, 64>}]} {
    %c0 = arith.constant 0 : index
    %c0_0 = arith.constant 0 : index
    %c0_1 = arith.constant 0 : index
    %0 = vector.load %arg3[%c0, %c0_0, %c0_1] : memref<1x8x32xbf16, #tpu.memory_space<vmem>>, vector<1x8x32xbf16>
    %1 = vector.shape_cast %0 : vector<1x8x32xbf16> to vector<8x32xbf16>
    %c0_2 = arith.constant 0 : index
    %c0_3 = arith.constant 0 : index
    %c0_4 = arith.constant 0 : index
    %2 = vector.load %arg4[%c0_2, %c0_3, %c0_4] : memref<1x32x64xbf16, #tpu.memory_space<vmem>>, vector<1x32x64xbf16>
    %3 = vector.shape_cast %2 : vector<1x32x64xbf16> to vector<32x64xbf16>
    %cst = arith.constant dense<0.000000e+00> : vector<8x64xf32>
    %4 = tpu.matmul %1, %3, %cst {dimension_numbers = #tpu.dot_dimension_numbers<[1], [0], [0], [1], [0, 0, 1, 1], [], []>} : vector<8x32xbf16>, vector<32x64xbf16>, vector<8x64xf32> -> vector<8x64xf32>
    %c0_5 = arith.constant 0 : index
    %c0_6 = arith.constant 0 : index
    %c0_7 = arith.constant 0 : index
    %5 = vector.load %arg5[%c0_5, %c0_6, %c0_7] : memref<1x1x64xf32, #tpu.memory_space<vmem>>, vector<1x1x64xf32>
    %6 = vector.shape_cast %5 : vector<1x1x64xf32> to vector<1x64xf32>
    %7 = vector.broadcast %6 : vector<1x64xf32> to vector<8x64xf32>
    %8 = arith.addf %4, %7 : vector<8x64xf32>
    %9 = arith.truncf %8 : vector<8x64xf32> to vector<8x64xbf16>
    %c0_8 = arith.constant 0 : index
    %c0_9 = arith.constant 0 : index
    %c0_10 = arith.constant 0 : index
    %10 = vector.load %arg6[%c0_8, %c0_9, %c0_10] : memref<1x8x64xbf16, #tpu.memory_space<vmem>>, vector<1x8x64xbf16>
    %11 = vector.shape_cast %10 : vector<1x8x64xbf16> to vector<8x64xbf16>
    %12 = vector.shape_cast %9 : vector<8x64xbf16> to vector<1x8x64xbf16>
    tpu.vector_store %arg6[%c0_8, %c0_9, %c0_10], %12 {strides = array<i32>} : memref<1x8x64xbf16, #tpu.memory_space<vmem>>, vector<1x8x64xbf16>,
    return
  }
  func.func @transform_0(%arg0: i32, %arg1: i32, %arg2: memref<3xi32, #tpu.memory_space<smem>>) -> (i32, i32, i32) {
    %0 = arith.index_cast %arg0 : i32 to index
    %1 = memref.load %arg2[%0] : memref<3xi32, #tpu.memory_space<smem>>
    %c0_i32 = arith.constant 0 : i32
    %c0_i32_0 = arith.constant 0 : i32
    return %1, %arg1, %c0_i32 : i32, i32, i32
  }
  func.func @transform_1(%arg0: i32, %arg1: i32, %arg2: memref<3xi32, #tpu.memory_space<smem>>) -> (i32, i32, i32) {
    %c0_i32 = arith.constant 0 : i32
    %c0_i32_0 = arith.constant 0 : i32
    %c0_i32_1 = arith.constant 0 : i32
    return %arg0, %c0_i32, %c0_i32_0 : i32, i32, i32
  }
  func.func @transform_2(%arg0: i32, %arg1: i32, %arg2: memref<3xi32, #tpu.memory_space<smem>>) -> (i32, i32, i32) {
    %c0_i32 = arith.constant 0 : i32
    %c0_i32_0 = arith.constant 0 : i32
    %c0_i32_1 = arith.constant 0 : i32
    return %arg0, %c0_i32, %c0_i32_0 : i32, i32, i32
  }
  func.func @transform_3(%arg0: i32, %arg1: i32, %arg2: memref<3xi32, #tpu.memory_space<smem>>) -> (i32, i32, i32) {
    %c0_i32 = arith.constant 0 : i32
    %c0_i32_0 = arith.constant 0 : i32
    return %arg0, %arg1, %c0_i32 : i32, i32, i32
  }
}

</mosaic_0001>

<bundles_post_ra>
// kernel: tpu_custom_call.1
= control target key start
LH: loop header
LB: loop body
LE: loop exit
PB: predicated region body
PF: predicated region fallthrough
CT: control target
= control target key end

     0   :  { %s908_s18 = smov [#allocation3]   ;;  %s1234_s0 = inlined_call_operand.hbm [shape: s32[3], index: 0, kind: input, shape index: {}]   ;;  %s1235_s1 = inlined_call_operand.hbm [shape: bf16[2,16,32], index: 1, kind: input, shape index: {}]   ;;  %s1236_s2 = inlined_call_operand.hbm [shape: bf16[3,32,64], index: 2, kind: input, shape index: {}]   ;;  %s1237_s3 = inlined_call_operand.hbm [shape: f32[3,1,64], index: 3, kind: input, shape index: {}]   ;;  %s1238_s4 = inlined_call_operand.hbm [shape: bf16[3,16,64], index: 4, kind: output, shape index: {}]  }
   0x1   :  { %1255 = sst [smem:[#allocation33_spill]] %s1236_s2  ;;  %s10_s17 = sshll.u32 %s1234_s0, 4  ;;  %s11_s17 = int_to_ptr.hbm [resolvable:$true] %s10_s17 }
   0x2   :  { %1256 = sst [smem:[#allocation34_spill]] %s1238_s4 }
   0x3   :  { %13 = dma.hbm_to_smem %s11_s17, 16, %s908_s18, [#allocation2] }
   0x4   :  { %838 = dma.done.wait [#allocation2], 16 }
   0x5   :  { %839 = vsyncadd [#allocation2], 4294967280 }
   0x6   :  { %16 = sfence }
   0x7   :  { %17 = vsyncpa [#allocation5], 0 }
   0x8   :  { %19 = vsyncpa [#allocation5 + $0x1], 0 }
   0x9   :  { %20 = vsyncpa [#allocation8], 0 }
   0xa   :  { %22 = vsyncpa [#allocation8 + $0x1], 0 }
   0xb   :  { %23 = vsyncpa [#allocation6], 0 }
   0xc   :  { %25 = vsyncpa [#allocation6 + $0x1], 0  ;;  %s939_s19 = smov 0   ;;  %s941_s20 = smov 0  }
   0xd   :  { %s943_s21 = smov 0   ;;  %s945_s22 = smov 0  }
   0xe   :  { %s947_s0 = smov 0   ;;  %s949_s23 = smov 0  }
   0xf   :  { %s951_s24 = smov 0   ;;  %s953_s25 = smov 0  }
  0x10   :  { %s955_s26 = smov 0   ;;  %s957_s27 = smov 0  }
  0x11   :  { %s959_s28 = smov 0   ;;  %s961_s29 = smov 0  }
  0x12   :  { %s963_s30 = smov 0   ;;  %s965_s5 = smov 0  }
  0x13 LB: > { %1257 = sst [smem:[#allocation17_spill]] %s854_s19  ;;  %p62_p0 = scmp.eq.s32.totalorder %s906_s5, 0  ;;  %s906_s5 = sphi %s965_s5, %s31_s5   ;;  %s902_s30 = sphi %s963_s30, %s1317_s30   ;;  %s898_s29 = sphi %s961_s29, %s1316_s29   ;;  %s894_s28 = sphi %s959_s28, %s1315_s28   ;;  %s890_s27 = sphi %s957_s27, %s1314_s27   ;;  %s886_s26 = sphi %s955_s26, %s1313_s26   ;;  %s882_s25 = sphi %s953_s25, %s1312_s25   ;;  %s878_s24 = sphi %s951_s24, %s1311_s24   ;;  %s874_s23 = sphi %s949_s23, %s1310_s23   ;;  %s870_s0 = sphi %s947_s0, %s1309_s0   ;;  %s866_s22 = sphi %s945_s22, %s1301_s22   ;;  %s862_s21 = sphi %s943_s21, %s1308_s21   ;;  %s858_s20 = sphi %s941_s20, %s1299_s20   ;;  %s854_s19 = sphi %s939_s19, %s1298_s19  }
  0x14   : > { %1258 = sst [smem:[#allocation18_spill]] %s858_s20  ;;  %p87_p1 = scmp.ne.s32.totalorder %s874_s23, %s870_s0 }
  0x15   : > { %1259 = sst [smem:[#allocation19_spill]] %s862_s21  ;;  %p93_p2 = scmp.ne.s32.totalorder %s870_s0, %s866_s22 }
  0x16   : > { %1260 = sst [smem:[#allocation20_spill]] %s870_s0  ;;  %p534_p3 = scmp.lt.s32.totalorder %s906_s5, 6 }
  0x17   : > { %1261 = sst [smem:[#allocation21_spill]] %s886_s26  ;;  %p89_p4 = por %p87_p1, %p62_p0 }
  0x18   : > { %1262 = sst [smem:[#allocation22_spill]] %s890_s27  ;;  %s193_s7 = sand.u32 1, %s906_s5  }
  0x19   : > { %1263 = sst [smem:[#allocation23_spill]] %s894_s28  ;;  %s1239_s8 = sand.u32 1, %s874_s23  }
  0x1a   : > { %1264 = sst [smem:[#allocation24_spill]] %s906_s5  ;;  %s484_s9 = sshll.u32 %s1239_s8, 4 }
  0x1b   : > { %s505_s10 = sshll.u32 %s902_s30, 4  ;;  %s1265_s2 = sld [smem:[#allocation33_spill]] }
  0x1c   : > { %s197_s15 = scalar_lea.vmem [#allocation7], %s484_s9  ;;  %p1028_p5 = pnand %p534_p3, %p89_p4 }
  0x1d   : > { %s205_s16 = sshll.u32 %s197_s15, 4  ;;  %p487_p6 = scmp.ge.s32.totalorder %s906_s5, 1  ;;  %s206_s16 = int_to_ptr.vmem [resolvable:$true] %s205_s16 }
  0x1e   : > { %p230_p7 = scmp.lt.s32.totalorder %s906_s5, 7  ;;  %s1034_s18 = scalar_lea.sflag [#allocation8], %s193_s7 }
  0x1f   : > { %s909_s9 = smov 64   ;;  %s1044_s12 = sadd.s32 4294967295, %s906_s5  }
  0x20   : > { %p1039_p8 = pnand %p487_p6, %p230_p7  ;;  %s40_s7 = sadd.s32 1, %s898_s29 }
  0x21   : > { %s202_s13 = scalar_lea.hbm %s1265_s2, %s505_s10  ;;  %s910_s10 = smov 4  }
  0x22   : > { %s203_s14 = sshll.u32 %s202_s13, 4  ;;  %p41_p9 = scmp.ge.s32.totalorder %s40_s7, 2  ;;  %s204_s14 = int_to_ptr.hbm [resolvable:$true] %s203_s14 }
  0x23   : > { %526 = dma.hbm_to_vmem [thread:$0]  (!%p1028_p5), %s204_s14, 256, %s206_s16, %s1034_s18, %s909_s9, %s909_s9, %s910_s10  }
  0x24   : > { %s43_s15 = sadd.s32 1, %s902_s30  ;;  %s47_s8 = sld [smem:[#allocation3 + %s902_s30]] }
  0x25   : > { %s1319_s7 = smov (%p41_p9, %s40_s7), 0  ;;  %s1321_s15 = smov (!%p41_p9, %s43_s15), %s902_s30 }
  0x26   : > { %1268 = sst [smem:[#allocation25_spill]] %s1319_s7  ;;  %s50_s14 = ssub.s32 %s898_s29, %s1319_s7 }
  0x27   : > { %p61_p10 = scmp.ne.s32.totalorder %s886_s26, %s882_s25  ;;  %p45_p11 = scmp.ge.s32.totalorder %s1321_s15, 3 }
  0x28   : > { %p67_p12 = scmp.ne.s32.totalorder %s882_s25, %s878_s24  ;;  %p68_p1 = scmp.eq.s32.totalorder %s1044_s12, 0 }
  0x29   : > { %p1062_p13 = por %p62_p0, %p61_p10  ;;  %s1323_s15 = smov (%p45_p11, %s1321_s15), 0 }
  0x2a   : > { %1270 = sst [smem:[#allocation26_spill]] %s1323_s15  ;;  %p1069_p4 = por %p68_p1, %p67_p12 }
  0x2b   : > { %p1076_p6 = por %p93_p2, %p68_p1  ;;  %s48_s24 = sld [smem:[#allocation3 + %s1323_s15]] }
  0x2c   : > { %s77_s6 = ssub.s32 %s902_s30, %s1323_s15  ;;  %s134_s2 = sadd.s32 1, %s862_s21 }
  0x2d   : > { %s1272_s10 = scalar_select %p1076_p6, 1, 0 }
  0x2e   : > { %p78_p0 = scmp.eq.s32.totalorder %s77_s6, 0  ;;  %s131_s13 = sor.u32 %s77_s6, %s50_s14 }
  0x2f   : > { %1273 = sst [smem:[#allocation27_spill]] %s1272_s10  ;;  %p132_p7 = scmp.eq.s32.totalorder %s131_s13, 0 }
  0x30   : > { %s1274_s7 = sadd.s32 1, %s874_s23  ;;  %p144_p2 = scmp.ne.s32.totalorder %s862_s21, %s858_s20 }
  0x31   : > { %s1087_s4 = scalar_select %p78_p0, %s874_s23, %s1274_s7  }
  0x32   : > { %s1090_s22 = scalar_select %p132_p7, %s862_s21, %s134_s2  }
  0x33   : > { %1275 = sst [smem:[#allocation28_spill]] %s1087_s4  ;;  %p145_p9 = scmp.eq.s32.totalorder %s1044_s12, 5 }
  0x34   : > { %1276 = sst [smem:[#allocation29_spill]] %s1090_s22  ;;  %s49_s15 = ssub.s32 %s47_s8, %s48_s24 }
  0x35   : > { %p150_p10 = scmp.ne.s32.totalorder %s858_s20, %s854_s19  ;;  %s51_s27 = sor.u32 %s50_s14, %s49_s15 }
  0x36   : > { %p1097_p11 = por %p145_p9, %p144_p2  ;;  %p52_p12 = scmp.eq.s32.totalorder %s51_s27, 0 }
  0x37   : > { %s1279_s13 = sadd.s32 4294967294, %s906_s5   ;;  %s171_s7 = sand.u32 1, %s886_s26  }
  0x38   : > { %s1277_s6 = scalar_select %p1097_p11, 1, 0 }
  0x39   : > { %p151_p1 = scmp.eq.s32.totalorder %s1279_s13, 5  ;;  %p1108_p0 = pnand %p534_p3, %p1062_p13 }
  0x3a   : > { %1278 = sst [smem:[#allocation30_spill]] %s1277_s6  ;;  %s1281_s8 = sadd.s32 1, %s886_s26 }
  0x3b   : > { %s1115_s24 = scalar_select %p52_p12, %s886_s26, %s1281_s8  }
  0x3c   : > { %p1117_p7 = por %p151_p1, %p150_p10  ;;  %s481_s14 = sshll.u32 %s171_s7, 2 }
  0x3d   : > { %1282 = sst [smem:[#allocation31_spill]] %s1115_s24  ;;  %s221_s21 = scalar_lea.hbm %s1237_s3, %s902_s30 }
  0x3e   : > { %s1283_s15 = scalar_select %p1117_p7, 1, 0 }
  0x3f   : > { %s508_s27 = scalar_select %p1062_p13, [#allocation3], [#allocation11] }
  0x40   : > { %1284 = sst [smem:[#allocation32_spill]] %s1283_s15  ;;  %s223_s24 = sshll.u32 %s221_s21, 4  ;;  %s224_s24 = int_to_ptr.hbm [resolvable:$true] %s223_s24 }
  0x41   : > { %s509_s13 = scalar_select %p1062_p13, %s902_s30, 0 }
  0x42   : > { %s1325_s27 = smov (!%p534_p3, %s508_s27), [#allocation12]  ;;  %s1285_s26 = sand.u32 1, %s874_s23  }
  0x43   : > { %s1327_s13 = smov (!%p534_p3, %s509_s13), 0  ;;  %s218_s19 = scalar_lea.vmem [#allocation9], %s1285_s26 }
  0x44   : > { %s176_s8 = sld [smem:[%s1325_s27 + %s1327_s13]]  ;;  %s225_s6 = sshll.u32 %s218_s19, 4  ;;  %s226_s6 = int_to_ptr.vmem [resolvable:$true] %s225_s6 }
  0x45   : > { %529 = dma.hbm_to_vmem [thread:$0]  (!%p1028_p5), %s224_s24, 16, %s226_s6, %s1034_s18  }
  0x46   : > { %s175_s15 = scalar_lea.vmem [#allocation4], %s481_s14  ;;  %s172_s21 = scalar_lea.sflag [#allocation5], %s171_s7 }
  0x47   : > { %s186_s20 = sshll.u32 %s175_s15, 4  ;;  %p728_p13 = pneg %p1108_p0  ;;  %s187_s20 = int_to_ptr.vmem [resolvable:$true] %s186_s20 }
  0x4a   : > { %s482_s16 = sshll.u32 %s176_s8, 1 }
  0x4b   : > { %s180_s28 = sadd.s32 %s898_s29, %s482_s16 }
  0x4c   : > { %s483_s5 = sshll.u32 %s180_s28, 2  ;;  %s731_s28 = scalar_lea.hbm %s1235_s1, 16 }
  0x4d   : > { %s182_s4 = scalar_lea.hbm %s1235_s1, %s483_s5 }
  0x4e   : > { %s184_s22 = sshll.u32 %s182_s4, 4  ;;  %s185_s22 = int_to_ptr.hbm [resolvable:$true] %s184_s22 }
  0x4f   : > { %s724_s26 = sshra.s32 %s185_s22, 4  ;;  %s725_s26 = int_to_ptr.hbm [resolvable:$true] %s724_s26 }
  0x50   : > { %s726_s19 = scalar_lea.hbm %s725_s26, 4  ;;  %p732_p9 = scmp.lt.s32.totalorder %s725_s26, %s1235_s1 }
  0x51   : > { %p727_p3 = scmp.ne.s32.totalorder %s725_s26, %s726_s19  ;;  %p733_p10 = scmp.lt.s32.totalorder %s731_s28, %s726_s19 }
  0x53   : > { %p729_p5 = pnand %p728_p13, %p727_p3  ;;  %p734_p12 = por %p733_p10, %p732_p9 }
  0x55   : > { %p730_p2 = pneg %p729_p5 }
  0x57   : > { %p735_p1 = pnand %p734_p12, %p730_p2 }
  0x59   : > { %738 = shalt.err (!%p735_p1)
}
  0x5a   : > { %523 = dma.hbm_to_vmem [thread:$0]  (!%p1108_p0), %s185_s22, 64, %s187_s20, %s172_s21  }
  0x5b   : > { %234 = sbr.rel (%p1039_p8) target bundleno = 249 (0xf9), region = 32  ;;  %s236_s0 = sand.u32 (!%p1039_p8), 1, %s882_s25  }
  0x5c   : > { %s488_s5 = sshll.u32 (!%p1039_p8), %s236_s0, 2  ;;  %s237_s10 = scalar_lea.sflag (!%p1039_p8), [#allocation5], %s236_s0 }
  0x5d   : > { %s240_s7 = scalar_lea.vmem (!%p1039_p8), [#allocation4], %s488_s5 }
  0x60   : > { %841 = dma.done.wait (%p1069_p4), %s237_s10, 64  }
  0x61   : > { %843 = vsyncadd (%p1069_p4), %s237_s10, 4294967232  ;;  %s1286_s15 = sld [smem:[#allocation20_spill]]  ;;  %s246_s27 = sand.u32 1, %s1044_s12  }
  0x62   : > { %s247_s13 = scalar_lea.sflag [#allocation8], %s246_s27 }
  0x67   : > { %s248_s2 = sand.u32 1, %s1286_s15  }
  0x68   : > { %s489_s20 = sshll.u32 %s248_s2, 4 }
  0x69   : > { %s250_s11 = scalar_lea.vmem [#allocation7], %s489_s20 }
  0x6a   : > { %845 = dma.done.wait (%p1076_p6), %s247_s13, 272  }
  0x6b   : > { %847 = vsyncadd (%p1076_p6), %s247_s13, 4294967024  ;;  %s1288_s8 = sld [smem:[#allocation23_spill]]  ;;  %v507_v0 = vld [vmem:[%s250_s11 + $0x8] sm:$0xff]  ;;  %s259_s22 = scalar_lea.vmem [#allocation9], %s248_s2  ;;  %v506_v1 = vld [vmem:[%s250_s11] sm:$0xff]  ;;  %vm315_vm0 = vcmask 261120  }
  0x6c   : > { %s1289_s16 = sld [smem:[#allocation18_spill]]  ;;  %325 = vmatpush.bf16.msra.mxu0 %v507_v0  ;;  %v294_v2 = vld [vmem:[%s240_s7] sm:$0xf]  ;;  %vm333_vm1 = vcmask 519168  }
  0x6d   : > { %s1290_s4 = sld [smem:[#allocation22_spill]]  ;;  %v651_v3 = vld [vmem:[%s259_s22] ss:$0 sm:$0xff] }
  0x6e   : > { %s1291_s28 = sld [smem:[#allocation34_spill]] }
  0x70   : > { %326 = vmatpush.bf16.msra.mxu0 %v506_v1 }
  0x71   : > { %s501_s12 = sshll.u32 %s1288_s8, 1 }
  0x72   : > { %s289_s9 = sand.u32 1, %s1289_s16  }
  0x73   : > { %499 = vmatmul.msk.bf16.vlgmr.msra.gmra.mxu0 %vm315_vm0, %v294_v2  ;;  %s346_s21 = sadd.s32 %s1290_s4, %s501_s12  ;;  %s490_s26 = sshll.u32 %s289_s9, 2 }
  0x74   : > { %s502_s19 = sshll.u32 %s346_s21, 2  ;;  %s1292_s6 = smov %s1291_s28 }
  0x75   : > { %s348_s24 = scalar_lea.hbm %s1291_s28, %s502_s19  ;;  %s291_s5 = scalar_lea.vmem [#allocation10], %s490_s26 }
  0x76   : > { %s350_s10 = sshll.u32 %s291_s5, 4  ;;  %s352_s15 = sshll.u32 %s348_s24, 4  ;;  %s351_s10 = int_to_ptr.vmem [resolvable:$true] %s350_s10  ;;  %s353_s15 = int_to_ptr.hbm [resolvable:$true] %s352_s15 }
  0x77   : > { %s336_s7 = scalar_lea.sflag [#allocation6], %s289_s9  ;;  %s768_s14 = sshra.s32 %s353_s15, 4  ;;  %s769_s14 = int_to_ptr.hbm [resolvable:$true] %s768_s14 }
  0x78   : > { %s770_s27 = scalar_lea.hbm %s769_s14, 4  ;;  %s774_s13 = scalar_lea.hbm %s1292_s6, 24 }
  0x79   : > { %p771_p8 = scmp.ne.s32.totalorder %s769_s14, %s770_s27  ;;  %p775_p0 = scmp.lt.s32.totalorder %s769_s14, %s1292_s6 }
  0x7a   : > { %p776_p3 = scmp.lt.s32.totalorder %s774_s13, %s770_s27 }
  0x7b   : > { %p772_p4 = pnand %p771_p8, %p1097_p11 }
  0x7c   : > { %p777_p13 = por %p776_p3, %p775_p0 }
  0x7d   : > { %p773_p6 = pneg %p772_p4 }
  0x7f   : > { %p778_p5 = pnand %p777_p13, %p773_p6 }
  0xf0   : > { %v328_v4 = vpop.f32.mrf.mxu0 }
  0xf1   : > { %v329_v5 = vadd.f32 %v651_v3, %v328_v4 }
  0xf3   : > { %v332_v6 = vpack.c.bf16 %v329_v5, %v329_v5 }
  0xf5   : > { %334 = vst.msk [vmem:[%s291_s5] sm:$0xf] %vm333_vm1, %v332_v6 }
  0xf6   : > { %781 = shalt.err (!%p778_p5)
}
  0xf7   : > { %516 = dma.vmem_to_hbm [thread:$0]  (%p1097_p11), %s351_s10, 64, %s353_s15, %s336_s7  }
  0xf8   : > { %v330_v7 = vpop.f32.mrf.mxu0 }
  0xf9 PF: > { %s1294_s16 = sld [smem:[#allocation24_spill]] }
  0xfa   : > { %s1295_s4 = sld [smem:[#allocation17_spill]] }
  0xff   : > { %p535_p2 = scmp.ge.s32.totalorder %s1294_s16, 2 }
 0x100   : > { %s364_s12 = sand.u32 1, %s1295_s4  }
 0x101   : > { %p531_p9 = pnand %p535_p2, %p1117_p7  ;;  %s365_s9 = scalar_lea.sflag [#allocation6], %s364_s12 }
 0x103   : > { %p532_p10 = pneg %p531_p9 }
 0x105   : > { %849 = dma.done.wait (%p532_p10), %s365_s9, 64  }
 0x106   : > { %851 = vsyncadd (%p532_p10), %s365_s9, 4294967232  ;;  %s31_s5 = sadd.s32 1, %s1294_s16   ;;  %s1298_s19 = sld [smem:[#allocation18_spill]] }
 0x107   : > { %p1187_p12 = scmp.ge.s32.totalorder %s31_s5, 8   ;;  %s1299_s20 = sld [smem:[#allocation19_spill]] }
 0x108   : > { %s1300_s26 = sld [smem:[#allocation29_spill]]  ;;  %s1309_s0 = smov %s874_s23 }
 0x109   : > { %s1301_s22 = sld [smem:[#allocation20_spill]]  ;;  %s1311_s24 = smov %s882_s25 }
 0x10a   : > { %s1302_s17 = sld [smem:[#allocation28_spill]]  ;;  %s1314_s27 = smov %s898_s29 }
 0x10b   : > { %s1303_s18 = sld [smem:[#allocation21_spill]] }
 0x10c   : > { %s1304_s28 = sld [smem:[#allocation31_spill]] }
 0x10d   : > { %s1305_s10 = sld [smem:[#allocation25_spill]] }
 0x10e   : > { %s1306_s15 = sld [smem:[#allocation26_spill]]  ;;  %s1308_s21 = smov %s1300_s26 }
 0x110   : > { %s1310_s23 = smov %s1302_s17  ;;  %30 = sbr.rel (!%p1187_p12) target bundleno = 19 (0x13), region = 101 }
 0x111   : > { %s1312_s25 = smov %s1303_s18 }
 0x112   : > { %s1313_s26 = smov %s1304_s28  ;;  %s1315_s28 = smov %s902_s30 }
 0x113   : > { %s1316_s29 = smov %s1305_s10 }
 0x114   : > { %s1317_s30 = smov %s1306_s15 }
 0x115   :  { %371 = vsyncpa [#allocation5], 1 }
 0x116   :  { %373 = vsyncpa [#allocation5 + $0x1], 1 }
 0x117   :  { %374 = vsyncpa [#allocation8], 1 }
 0x118   :  { %376 = vsyncpa [#allocation8 + $0x1], 1 }
 0x119   :  { %377 = vsyncpa [#allocation6], 1 }
 0x11a   :  { %379 = vsyncpa [#allocation6 + $0x1], 1 }

</bundles_post_ra>
